<compile_context>
chip_gen: v5e
topology: v5e:2x2
jax: 0.10.0
libtpu: 0.0.40
codegen_flags: <defaults>
</compile_context>

<pallas_src>
import functools

import jax
import jax.numpy as jnp
from jax import lax
from jax.experimental import pallas as pl
from jax.experimental.pallas import tpu as pltpu

_LANES = 128
_SUBLANES = 8
_INNER_ROWS = 128  # rows per in-kernel compute chunk (multiple of 32 => OK for f32/bf16/int8 packing)


@functools.lru_cache(maxsize=None)
def _detected_tensorcores() -> int:
    """Best-effort TensorCores-per-device count.

    Only v7x-style chips expose 2 TCs per Pallas device; default to 1 so
    single-core v5e/v6e (and anything unknown) take the simple path.
    """
    try:
        kind = jax.devices()[0].device_kind.lower()
    except Exception:
        return 1
    if "v7" in kind or "7x" in kind:
        return 2
    return 1


def _round_up(x: int, m: int) -> int:
    return pl.cdiv(x, m) * m


def _make_sq_diff_kernel(tile_rows, inner_rows, tiles_per_split, rows, need_mask):
    """Build the per-tile sum-of-squared-diff kernel.

    Grid = (n_splits, tiles_per_split); output block (1, 8, 128) for split s is
    resident in VMEM across the inner reduction axis t (zeroed at t == 0).
    """
    n_chunks = tile_rows // inner_rows

    def kernel(yt_ref, yp_ref, part_ref):
        s = pl.program_id(0)
        t = pl.program_id(1)

        @pl.when(t == 0)
        def _():
            part_ref[...] = jnp.zeros_like(part_ref)

        # Global row offset of this tile. Deliberately UN-clamped: tiles past
        # the end of the array (odd tile count split across cores) get a
        # non-positive row budget and are fully masked below.
        tile_row0 = (s * tiles_per_split + t) * tile_rows

        def body(i, acc):
            r0 = pl.multiple_of(i * inner_rows, inner_rows)
            a = yt_ref[pl.ds(r0, inner_rows), :].astype(jnp.float32)
            b = yp_ref[pl.ds(r0, inner_rows), :].astype(jnp.float32)
            d = a - b
            sq = d * d
            if need_mask:
                # Branch-free masking of rows past the true row count; select
                # (not multiply), so garbage/NaN in the padded region is inert.
                row = tile_row0 + r0 + lax.broadcasted_iota(
                    jnp.int32, (inner_rows, _LANES), 0
                )
                sq = jnp.where(row < rows, sq, 0.0)
            # (inner, 128) -> (inner//8, 8, 128): trailing dims stay
            # vreg-aligned, so the axis-0 sum is plain VPU vreg adds.
            return acc + jnp.sum(
                sq.reshape(inner_rows // _SUBLANES, _SUBLANES, _LANES), axis=0
            )

        acc = lax.fori_loop(
            0, n_chunks, body, jnp.zeros((_SUBLANES, _LANES), jnp.float32)
        )
        part_ref[...] += acc[None]

    return kernel


@functools.partial(jax.jit, static_argnames=("tile_rows",))
def _mse_pallas(y_true, y_pred, *, tile_rows=4096):
    """MSE(y_true, y_pred) computed with a tiled Pallas reduction kernel."""
    assert y_true.shape == y_pred.shape, (y_true.shape, y_pred.shape)
    n = y_true.size
    yt = y_true.reshape(-1)
    yp = y_pred.reshape(-1)

    # Pad only to a 128-lane multiple (<=127 zeros, ragged sizes only);
    # everything else (partial tiles) is masked in-kernel, so the previous
    # whole-tile-granularity jnp.pad copy is gone.
    n_lane = _round_up(n, _LANES)
    if n_lane != n:
        yt = jnp.pad(yt, (0, n_lane - n))
        yp = jnp.pad(yp, (0, n_lane - n))
    rows = n_lane // _LANES
    yt2 = yt.reshape(rows, _LANES)
    yp2 = yp.reshape(rows, _LANES)

    # Tile rows: scale the requested f32-row budget by dtype width so bf16
    # streams the same bytes per step as f32; clamp to the problem size; keep
    # a multiple of the inner chunk (itself 32-aligned for packed dtypes).
    it_t = jnp.dtype(yt2.dtype).itemsize
    it_p = jnp.dtype(yp2.dtype).itemsize
    inner = _INNER_ROWS
    tr = tile_rows * max(1, 4 // max(it_t, it_p))
    tr = max(inner, _round_up(min(tr, rows), inner))
    # VMEM: 2 operands x 2 pipeline buffers x tr*128*itemsize  (default f32:
    # 4 x 2 MiB = 8 MiB), comfortably under the 32 MiB scoped limit everywhere
    # including v7x (64 MiB physical).

    total_tiles = pl.cdiv(rows, tr)
    cores = _detected_tensorcores()
    n_splits = cores if (cores > 1 and total_tiles >= cores) else 1
    tiles_per_split = pl.cdiv(total_tiles, n_splits)
    need_mask = (n_splits * tiles_per_split * tr) != rows

    def in_index(s, t):
        g = s * tiles_per_split + t
        # Clamp the DMA source for tiles past the end (their contribution is
        # masked to zero in-kernel); never reads outside the array.
        return (jnp.minimum(g, total_tiles - 1), 0)

    in_spec = pl.BlockSpec((tr, _LANES), in_index)
    kernel = _make_sq_diff_kernel(tr, inner, tiles_per_split, rows, need_mask)

    if n_splits > 1:
        semantics = (pltpu.CORE_PARALLEL, pltpu.ARBITRARY)
    else:
        semantics = ("arbitrary", "arbitrary")

    bytes_accessed = n_lane * (it_t + it_p) + n_splits * _SUBLANES * _LANES * 4
    partial = pl.pallas_call(
        kernel,
        out_shape=jax.ShapeDtypeStruct((n_splits, _SUBLANES, _LANES), jnp.float32),
        grid=(n_splits, tiles_per_split),
        in_specs=[in_spec, in_spec],
        out_specs=pl.BlockSpec((1, _SUBLANES, _LANES), lambda s, t: (s, 0, 0)),
        compiler_params=pltpu.CompilerParams(
            dimension_semantics=semantics,
            vmem_limit_bytes=32 * 1024 * 1024,
        ),
        cost_estimate=pl.CostEstimate(
            flops=3 * n, transcendentals=0, bytes_accessed=bytes_accessed
        ),
    )(yt2, yp2)

    # Single cheap cross-lane/cross-sublane reduce + normalization with the
    # *true* element count, outside the hot loop.
    return jnp.sum(partial) * (1.0 / float(n))


class BaseLossPallas:
    """JAX/Pallas port of BaseLoss with a concrete MSE `value`.

    # TODO(synk): BaseLoss.value() is abstract in the original module; a
    # concrete MSE over scene images is used here as the representative
    # subclass implementation.
    # TODO(synk): no custom_vjp is attached to the Pallas call; only the
    # forward pass is implemented (matching the task scope).
    """

    def __init__(self):
        # MeanMetric state (sum of updates, total weight).
        self._sum = jnp.zeros((), jnp.float32)
        self._weight = jnp.zeros((), jnp.float32)

    # the (here-concrete) BaseLoss.value
    def value(self, y_true, y_pred):
        return _mse_pallas(y_true, y_pred)

    # BaseLoss.forward
    def forward(self, y_true, y_pred, update: bool = True):
        value = self.value(y_true, y_pred)
        if update:
            # torch.no_grad() equivalent: metric state kept out of autodiff.
            self.update(jax.lax.stop_gradient(value))
        return value

    __call__ = forward

    # BaseLoss.update
    def update(self, value):
        v = jnp.asarray(value, jnp.float32).reshape(())
        self._sum = self._sum + v
        self._weight = self._weight + 1.0
        return v

    # BaseLoss.compute  (MeanMetric: sum/weight; 0.0 if never updated)
    def compute(self):
        return jnp.where(
            self._weight > 0.0,
            self._sum / jnp.maximum(self._weight, 1.0),
            0.0,
        )

    # BaseLoss.reset
    def reset(self):
        self._sum = jnp.zeros((), jnp.float32)
        self._weight = jnp.zeros((), jnp.float32)

    def __str__(self):
        return f"{type(self).__name__}: {float(self.compute()):.4f}"

    def show(self):
        print(str(self))


if __name__ == "__main__":
    key = jax.random.PRNGKey(0)
    keys = jax.random.split(key, 10)

    # --- main test: SceneData stand-in, NCHW images -------------------------
    B, C, H, W = 2, 4, 16, 16
    y_true = jax.random.normal(keys[0], (B, C, H, W), dtype=jnp.float32)
    y_pred = jax.random.normal(keys[1], (B, C, H, W), dtype=jnp.float32)

    loss = BaseLossPallas()
    value = jax.block_until_ready(loss(y_true, y_pred, update=True))
    value2 = jax.block_until_ready(loss(y_true, y_pred, update=True))
    running_mean = jax.block_until_ready(loss.compute())

    ref = jnp.mean((y_true - y_pred) ** 2)
    assert jnp.allclose(value, ref, rtol=1e-5, atol=1e-5), (value, ref)
    assert jnp.allclose(value2, ref, rtol=1e-5, atol=1e-5)
    assert jnp.allclose(running_mean, ref, rtol=1e-5, atol=1e-5)

    # --- ragged shape: lane-pad + in-kernel row masking, single tile ---------
    a = jax.random.normal(keys[2], (2, 3, 17, 9), dtype=jnp.float32)
    b = jax.random.normal(keys[3], (2, 3, 17, 9), dtype=jnp.float32)
    v = jax.block_until_ready(_mse_pallas(a, b))
    r = jnp.mean((a - b) ** 2)
    assert jnp.allclose(v, r, rtol=1e-5, atol=1e-5), (v, r)

    # --- multi-tile reduction + bf16 inputs (byte-scaled tile path) ----------
    a16 = jax.random.normal(keys[4], (2, 4, 64, 64), dtype=jnp.bfloat16)
    b16 = jax.random.normal(keys[5], (2, 4, 64, 64), dtype=jnp.bfloat16)
    v16 = jax.block_until_ready(_mse_pallas(a16, b16, tile_rows=64))
    r16 = jnp.mean((a16.astype(jnp.float32) - b16.astype(jnp.float32)) ** 2)
    assert jnp.allclose(v16, r16, rtol=1e-4, atol=1e-4), (v16, r16)

    # --- f32, multiple inner chunks inside one tile (default tile_rows) ------
    a32 = jax.random.normal(keys[6], (2, 4, 64, 64), dtype=jnp.float32)
    b32 = jax.random.normal(keys[7], (2, 4, 64, 64), dtype=jnp.float32)
    v32 = jax.block_until_ready(_mse_pallas(a32, b32))
    r32 = jnp.mean((a32 - b32) ** 2)
    assert jnp.allclose(v32, r32, rtol=1e-5, atol=1e-5), (v32, r32)

    # --- multi-tile + masked partial last tile --------------------------------
    am = jax.random.normal(keys[8], (3, 5, 50, 50), dtype=jnp.float32)
    bm = jax.random.normal(keys[9], (3, 5, 50, 50), dtype=jnp.float32)
    vm = jax.block_until_ready(_mse_pallas(am, bm, tile_rows=128))
    rm = jnp.mean((am - bm) ** 2)
    assert jnp.allclose(vm, rm, rtol=1e-5, atol=1e-5), (vm, rm)

    print("KERNEL_OK")
</pallas_src>

<mosaic_0001>
module attributes {stable_mosaic.version = 11 : i64} {
  func.func @kernel(%arg0: i32, %arg1: i32, %arg2: memref<128x128xf32, #tpu.memory_space<vmem>>, %arg3: memref<128x128xf32, #tpu.memory_space<vmem>>, %arg4: memref<1x8x128xf32, #tpu.memory_space<vmem>>) attributes {dimension_semantics = [#tpu.dimension_semantics<arbitrary>, #tpu.dimension_semantics<arbitrary>], iteration_bounds = array<i64: 1, 1>, scalar_prefetch = 0 : i64, scratch_operands = 0 : i64, tpu.core_type = #tpu.core_type<tc>, window_params = [{transform_indices = @transform_0, window_bounds = array<i64: 128, 128>}, {transform_indices = @transform_1, window_bounds = array<i64: 128, 128>}, {transform_indices = @transform_2, window_bounds = array<i64: 1, 8, 128>}]} {
    %c0_i32 = arith.constant 0 : i32
    %0 = arith.cmpi eq, %arg1, %c0_i32 : i32
    %1 = arith.extui %0 : i1 to i32
    %c0_i32_0 = arith.constant 0 : i32
    %2 = arith.cmpi ne, %1, %c0_i32_0 : i32
    scf.if %2 {
      %cst_13 = arith.constant 0.000000e+00 : f32
      %30 = vector.broadcast %cst_13 : f32 to vector<1x8x128xf32>
      %c0_14 = arith.constant 0 : index
      %c0_15 = arith.constant 0 : index
      %c0_16 = arith.constant 0 : index
      %31 = vector.load %arg4[%c0_14, %c0_15, %c0_16] : memref<1x8x128xf32, #tpu.memory_space<vmem>>, vector<1x8x128xf32>
      tpu.vector_store %arg4[%c0_14, %c0_15, %c0_16], %30 {strides = array<i32>} : memref<1x8x128xf32, #tpu.memory_space<vmem>>, vector<1x8x128xf32>,
    } else {
    }
    %c1_i32 = arith.constant 1 : i32
    %3 = arith.muli %arg0, %c1_i32 : i32
    %4 = arith.addi %3, %arg1 : i32
    %c128_i32 = arith.constant 128 : i32
    %5 = arith.muli %4, %c128_i32 : i32
    %cst = arith.constant 0.000000e+00 : f32
    %6 = vector.broadcast %cst : f32 to vector<8x128xf32>
    %c0_i32_1 = arith.constant 0 : i32
    %c128_i32_2 = arith.constant 128 : i32
    %7 = arith.muli %c0_i32_1, %c128_i32_2 : i32
    %8 = tpu.assume_multiple %7, 128 : i32
    %9 = arith.index_cast %8 : i32 to index
    %c0 = arith.constant 0 : index
    %10 = vector.load %arg2[%9, %c0] : memref<128x128xf32, #tpu.memory_space<vmem>>, vector<128x128xf32>
    %11 = arith.index_cast %8 : i32 to index
    %c0_3 = arith.constant 0 : index
    %12 = vector.load %arg3[%11, %c0_3] : memref<128x128xf32, #tpu.memory_space<vmem>>, vector<128x128xf32>
    %13 = arith.subf %10, %12 : vector<128x128xf32>
    %14 = arith.mulf %13, %13 : vector<128x128xf32>
    %15 = arith.addi %5, %8 : i32
    %16 = tpu.iota {dimensions = array<i32: 0>} : vector<128x128xi32>
    %17 = vector.broadcast %15 : i32 to vector<128x128xi32>
    %18 = arith.addi %17, %16 : vector<128x128xi32>
    %c16_i32 = arith.constant 16 : i32
    %19 = vector.broadcast %c16_i32 : i32 to vector<128x128xi32>
    %20 = arith.cmpi slt, %18, %19 : vector<128x128xi32>
    %cst_4 = arith.constant 0.000000e+00 : f32
    %21 = vector.broadcast %cst_4 : f32 to vector<128x128xf32>
    %22 = arith.select %20, %14, %21 : vector<128x128xi1>, vector<128x128xf32>
    %23 = vector.shape_cast %22 : vector<128x128xf32> to vector<16x8x128xf32>
    %cst_5 = arith.constant dense<0.000000e+00> : vector<8x128xf32>
    %24 = vector.multi_reduction <add>, %23, %cst_5 [0] : vector<16x8x128xf32> to vector<8x128xf32>
    %25 = arith.addf %6, %24 : vector<8x128xf32>
    %c1_i32_6 = arith.constant 1 : i32
    %c0_7 = arith.constant 0 : index
    %c0_8 = arith.constant 0 : index
    %c0_9 = arith.constant 0 : index
    %26 = vector.load %arg4[%c0_7, %c0_8, %c0_9] : memref<1x8x128xf32, #tpu.memory_space<vmem>>, vector<1x8x128xf32>
    %27 = vector.shape_cast %25 : vector<8x128xf32> to vector<1x8x128xf32>
    %28 = arith.addf %26, %27 : vector<1x8x128xf32>
    %c0_10 = arith.constant 0 : index
    %c0_11 = arith.constant 0 : index
    %c0_12 = arith.constant 0 : index
    %29 = vector.load %arg4[%c0_10, %c0_11, %c0_12] : memref<1x8x128xf32, #tpu.memory_space<vmem>>, vector<1x8x128xf32>
    tpu.vector_store %arg4[%c0_10, %c0_11, %c0_12], %28 {strides = array<i32>} : memref<1x8x128xf32, #tpu.memory_space<vmem>>, vector<1x8x128xf32>,
    return
  }
  func.func @transform_0(%arg0: i32, %arg1: i32) -> (i32, i32) {
    %c1_i32 = arith.constant 1 : i32
    %0 = arith.muli %arg0, %c1_i32 : i32
    %1 = arith.addi %0, %arg1 : i32
    %c0_i32 = arith.constant 0 : i32
    %2 = arith.minsi %1, %c0_i32 : i32
    %c0_i32_0 = arith.constant 0 : i32
    %c0_i32_1 = arith.constant 0 : i32
    return %2, %c0_i32_0 : i32, i32
  }
  func.func @transform_1(%arg0: i32, %arg1: i32) -> (i32, i32) {
    %c1_i32 = arith.constant 1 : i32
    %0 = arith.muli %arg0, %c1_i32 : i32
    %1 = arith.addi %0, %arg1 : i32
    %c0_i32 = arith.constant 0 : i32
    %2 = arith.minsi %1, %c0_i32 : i32
    %c0_i32_0 = arith.constant 0 : i32
    %c0_i32_1 = arith.constant 0 : i32
    return %2, %c0_i32_0 : i32, i32
  }
  func.func @transform_2(%arg0: i32, %arg1: i32) -> (i32, i32, i32) {
    %c0_i32 = arith.constant 0 : i32
    %c0_i32_0 = arith.constant 0 : i32
    %c0_i32_1 = arith.constant 0 : i32
    return %arg0, %c0_i32, %c0_i32_0 : i32, i32, i32
  }
}

</mosaic_0001>

<bundles_post_ra>
// kernel: _mse_pallas.1
= control target key start
LH: loop header
LB: loop body
LE: loop exit
PB: predicated region body
PF: predicated region fallthrough
CT: control target
= control target key end

     0   :  { %s299_s0 = inlined_call_operand.vmem [shape: f32[16,128], index: 0, kind: input, shape index: {}]   ;;  %s300_s1 = inlined_call_operand.vmem [shape: f32[16,128], index: 1, kind: input, shape index: {}]   ;;  %s301_s2 = inlined_call_operand.vmem [shape: f32[1,8,128], index: 2, kind: output, shape index: {}]  }
   0x1   :  { %v102_v0 = vld [vmem:[%s299_s0] sm:$0xff]  ;;  %v103_v1 = vld [vmem:[%s299_s0 + $0x8] sm:$0xff] }
   0x2   :  { %v118_v2 = vld [vmem:[%s300_s1] sm:$0xff]  ;;  %v119_v3 = vld [vmem:[%s300_s1 + $0x8] sm:$0xff] }
   0x3   :  { %v134_v4 = vsub.f32 %v102_v0, %v118_v2  ;;  %v135_v5 = vsub.f32 %v103_v1, %v119_v3 }
   0x5   :  { %v150_v6 = vmul.f32 %v134_v4, %v134_v4  ;;  %v151_v7 = vmul.f32 %v135_v5, %v135_v5 }
   0x7   :  { %v233_v8 = vadd.f32 %v151_v7, %v150_v6 }
   0x9   :  { %251 = vst [vmem:[%s301_s2] sm:$0xff] %v233_v8 }

</bundles_post_ra>
